<compile_context>
chip_gen: v5e
topology: v5e:2x2
jax: 0.10.0
libtpu: 0.0.40
codegen_flags: <defaults>
</compile_context>

<pallas_src>
import functools

import jax
import jax.numpy as jnp
import numpy as np
from jax import lax
from jax.experimental import pallas as pl
from jax.experimental.pallas import tpu as pltpu

ENC_LAYERS = 16     # enc_layers in the reference module
KH = KW = 2         # conv kernel size
PAD = 2             # conv padding
BN_EPS = 1e-5
LANE = 128


def _round_up(v, m):
    return (v + m - 1) // m * m


def _encoder_kernel(w_ref, x_ref, g_ref, b_ref, o_ref, *,
                    n_batch, wp, s_out, m_valid):
    """Fused conv (KH*KW shifted-view matmuls) + folded BN(train) + ReLU.

    w_ref: [KH*KW, Cout, Cin]   per-tap weights (kh-major, kw-minor tap order)
    x_ref: [N, Cin, S_pad]      spatially padded, flattened, lane-padded input
    g_ref: [Cout, 1]            BN gamma
    b_ref: [Cout, 1]            BN beta
    o_ref: [N, Cout, S_out]     lane-dense output; column s = h*Wp + w
    """
    # --- conv: per image, sum of 4 tap matmuls on lane-shifted views --------
    convs = []
    for n in range(n_batch):
        xi = x_ref[n]                                   # [Cin, S_pad] full load
        acc = None
        t = 0
        for kh in range(KH):
            for kw in range(KW):
                shift = kh * wp + kw                    # static lane shift
                rhs = xi[:, shift:shift + s_out]        # [Cin, S_out]
                tap = jnp.dot(w_ref[t], rhs,
                              preferred_element_type=jnp.float32)
                acc = tap if acc is None else acc + tap
                t += 1
        convs.append(acc)                               # [Cout, S_out] f32

    # --- training-mode batch stats.  Invalid/padded columns of `convs` are
    # exactly zero (see invariant in the header), so full-width sums are exact.
    inv_m = jnp.float32(1.0 / m_valid)
    ssum = sum(jnp.sum(c, axis=1, keepdims=True) for c in convs)      # [Cout,1]
    ssq = sum(jnp.sum(c * c, axis=1, keepdims=True) for c in convs)   # [Cout,1]
    mean = ssum * inv_m
    var = jnp.maximum(ssq * inv_m - mean * mean, 0.0)   # clamp f32 cancellation

    # --- BN affine folded into one FMA; ReLU; Dropout(p=0) is identity ------
    scale = g_ref[...] * lax.rsqrt(var + BN_EPS)        # [Cout, 1]
    shift_v = b_ref[...] - scale * mean                 # [Cout, 1]
    for n in range(n_batch):
        o_ref[n] = jnp.maximum(convs[n] * scale + shift_v, 0.0).astype(o_ref.dtype)


@jax.jit
def cnn_encoder_forward(x_nchw, conv_w, conv_b, bn_gamma, bn_beta):
    """x_nchw: [N, Cin, H, W] f32 -> [N, ENC_LAYERS, H+3, W+3] f32.

    `conv_b` is accepted for API parity with the PyTorch module but unused:
    the bias cancels exactly under training-mode BatchNorm mean subtraction.
    """
    del conv_b
    n, cin, h, w = x_nchw.shape
    cout = conv_w.shape[0]
    hp, wp = h + 2 * PAD, w + 2 * PAD
    ho, wo = hp - KH + 1, wp - KW + 1
    s_real = hp * wp                                   # flat padded spatial size
    max_shift = (KH - 1) * wp + (KW - 1)
    s_out = _round_up(ho * wp, LANE)                   # lane-dense output columns
    s_pad = _round_up(s_out + max_shift, LANE)         # lane-padded input columns
    m_valid = n * ho * wo

    # Static invariants that keep the in-kernel batch statistics exact.
    assert PAD >= KW - 1 and PAD >= KH - 1             # pads absorb tap overreach
    assert s_out <= s_real                             # extra cols land in pad rows
    assert s_pad >= s_out + max_shift                  # tap reads stay in buffer

    # Tiny wrapper-side layout prep (~16 KiB; XLA fuses pad+reshape+pad).
    xp = jnp.pad(x_nchw, ((0, 0), (0, 0), (PAD, PAD), (PAD, PAD)))
    x_flat = jnp.pad(xp.reshape(n, cin, s_real),
                     ((0, 0), (0, 0), (0, s_pad - s_real)))   # [N, Cin, S_pad]
    w_taps = jnp.transpose(conv_w, (2, 3, 0, 1)).reshape(KH * KW, cout, cin)
    gamma2 = bn_gamma.reshape(cout, 1)
    beta2 = bn_beta.reshape(cout, 1)

    kernel = functools.partial(_encoder_kernel, n_batch=n, wp=wp,
                               s_out=s_out, m_valid=m_valid)
    vmem_spec = pl.BlockSpec(memory_space=pltpu.MemorySpace.VMEM)
    out3 = pl.pallas_call(
        kernel,
        out_shape=jax.ShapeDtypeStruct((n, cout, s_out), jnp.float32),
        in_specs=[vmem_spec, vmem_spec, vmem_spec, vmem_spec],
        out_specs=vmem_spec,
        cost_estimate=pl.CostEstimate(
            flops=2 * n * KH * KW * cout * cin * s_out,
            transcendentals=0,
            bytes_accessed=4 * (n * cin * s_pad + KH * KW * cout * cin
                                + 2 * cout + n * cout * s_out)),
    )(w_taps, x_flat, gamma2, beta2)

    # [N, Cout, S_out] -> NCHW: drop the stride-pad column(s) and pad rows.
    out = out3[:, :, :ho * wp].reshape(n, cout, ho, wp)[:, :, :, :wo]
    return out


def _reference_forward(x_nchw, conv_w, conv_b, bn_gamma, bn_beta):
    """Pure-JAX reference (lax conv + bias + training-mode BN + ReLU)."""
    conv = lax.conv_general_dilated(
        x_nchw, conv_w, window_strides=(1, 1),
        padding=[(PAD, PAD), (PAD, PAD)],
        dimension_numbers=("NCHW", "OIHW", "NCHW"))
    conv = conv + conv_b.reshape(1, -1, 1, 1)
    mean = jnp.mean(conv, axis=(0, 2, 3), keepdims=True)
    var = jnp.mean((conv - mean) ** 2, axis=(0, 2, 3), keepdims=True)
    xhat = (conv - mean) * lax.rsqrt(var + BN_EPS)
    y = bn_gamma.reshape(1, -1, 1, 1) * xhat + bn_beta.reshape(1, -1, 1, 1)
    return jnp.maximum(y, 0.0)


if __name__ == "__main__":
    batch, in_channels, spatial = 2, 4, 16

    key = jax.random.PRNGKey(0)
    kx, kw, kb, kg, kbeta = jax.random.split(key, 5)

    x = jax.random.normal(kx, (batch, in_channels, spatial, spatial),
                          dtype=jnp.float32)

    # PyTorch-style uniform bound for the conv parameters; non-trivial BN
    # affine parameters so the folded scale/shift path is actually exercised.
    fan_in = in_channels * KH * KW
    bound = 1.0 / np.sqrt(fan_in)
    conv_w = jax.random.uniform(kw, (ENC_LAYERS, in_channels, KH, KW),
                                minval=-bound, maxval=bound, dtype=jnp.float32)
    conv_b = jax.random.uniform(kb, (ENC_LAYERS,),
                                minval=-bound, maxval=bound, dtype=jnp.float32)
    bn_gamma = 1.0 + 0.1 * jax.random.normal(kg, (ENC_LAYERS,), dtype=jnp.float32)
    bn_beta = 0.1 * jax.random.normal(kbeta, (ENC_LAYERS,), dtype=jnp.float32)

    out = jax.block_until_ready(
        cnn_encoder_forward(x, conv_w, conv_b, bn_gamma, bn_beta))
    ref = jax.block_until_ready(
        _reference_forward(x, conv_w, conv_b, bn_gamma, bn_beta))

    assert out.shape == (batch, ENC_LAYERS, spatial + 3, spatial + 3), out.shape
    np.testing.assert_allclose(np.asarray(out), np.asarray(ref),
                               rtol=1e-4, atol=1e-4)

    print("KERNEL_OK")
</pallas_src>

<mosaic_0001>
module attributes {stable_mosaic.version = 11 : i64} {
  func.func @_encoder_kernel(%arg0: memref<4x16x4xf32, #tpu.memory_space<vmem>>, %arg1: memref<2x4x512xf32, #tpu.memory_space<vmem>>, %arg2: memref<16x1xf32, #tpu.memory_space<vmem>>, %arg3: memref<16x1xf32, #tpu.memory_space<vmem>>, %arg4: memref<2x16x384xf32, #tpu.memory_space<vmem>>) attributes {dimension_semantics = [], scalar_prefetch = 0 : i64, scratch_operands = 0 : i64, tpu.core_type = #tpu.core_type<tc>} {
    %c0 = arith.constant 0 : index
    %c0_0 = arith.constant 0 : index
    %c0_1 = arith.constant 0 : index
    %0 = vector.load %arg1[%c0, %c0_0, %c0_1] : memref<2x4x512xf32, #tpu.memory_space<vmem>>, vector<1x4x512xf32>
    %1 = vector.shape_cast %0 : vector<1x4x512xf32> to vector<4x512xf32>
    %2 = vector.extract_strided_slice %1 {offsets = [0, 0], sizes = [4, 384], strides = [1, 1]} : vector<4x512xf32> to vector<4x384xf32>
    %c0_2 = arith.constant 0 : index
    %c0_3 = arith.constant 0 : index
    %c0_4 = arith.constant 0 : index
    %3 = vector.load %arg0[%c0_2, %c0_3, %c0_4] : memref<4x16x4xf32, #tpu.memory_space<vmem>>, vector<1x16x4xf32>
    %4 = vector.shape_cast %3 : vector<1x16x4xf32> to vector<16x4xf32>
    %cst = arith.constant dense<0.000000e+00> : vector<16x384xf32>
    %5 = tpu.matmul %4, %2, %cst {dimension_numbers = #tpu.dot_dimension_numbers<[1], [0], [0], [1], [0, 0, 1, 1], [], []>} : vector<16x4xf32>, vector<4x384xf32>, vector<16x384xf32> -> vector<16x384xf32>
    %6 = vector.extract_strided_slice %1 {offsets = [0, 1], sizes = [4, 384], strides = [1, 1]} : vector<4x512xf32> to vector<4x384xf32>
    %c1 = arith.constant 1 : index
    %c0_5 = arith.constant 0 : index
    %c0_6 = arith.constant 0 : index
    %7 = vector.load %arg0[%c1, %c0_5, %c0_6] : memref<4x16x4xf32, #tpu.memory_space<vmem>>, vector<1x16x4xf32>
    %8 = vector.shape_cast %7 : vector<1x16x4xf32> to vector<16x4xf32>
    %cst_7 = arith.constant dense<0.000000e+00> : vector<16x384xf32>
    %9 = tpu.matmul %8, %6, %cst_7 {dimension_numbers = #tpu.dot_dimension_numbers<[1], [0], [0], [1], [0, 0, 1, 1], [], []>} : vector<16x4xf32>, vector<4x384xf32>, vector<16x384xf32> -> vector<16x384xf32>
    %10 = arith.addf %5, %9 : vector<16x384xf32>
    %11 = vector.extract_strided_slice %1 {offsets = [0, 20], sizes = [4, 384], strides = [1, 1]} : vector<4x512xf32> to vector<4x384xf32>
    %c2 = arith.constant 2 : index
    %c0_8 = arith.constant 0 : index
    %c0_9 = arith.constant 0 : index
    %12 = vector.load %arg0[%c2, %c0_8, %c0_9] : memref<4x16x4xf32, #tpu.memory_space<vmem>>, vector<1x16x4xf32>
    %13 = vector.shape_cast %12 : vector<1x16x4xf32> to vector<16x4xf32>
    %cst_10 = arith.constant dense<0.000000e+00> : vector<16x384xf32>
    %14 = tpu.matmul %13, %11, %cst_10 {dimension_numbers = #tpu.dot_dimension_numbers<[1], [0], [0], [1], [0, 0, 1, 1], [], []>} : vector<16x4xf32>, vector<4x384xf32>, vector<16x384xf32> -> vector<16x384xf32>
    %15 = arith.addf %10, %14 : vector<16x384xf32>
    %16 = vector.extract_strided_slice %1 {offsets = [0, 21], sizes = [4, 384], strides = [1, 1]} : vector<4x512xf32> to vector<4x384xf32>
    %c3 = arith.constant 3 : index
    %c0_11 = arith.constant 0 : index
    %c0_12 = arith.constant 0 : index
    %17 = vector.load %arg0[%c3, %c0_11, %c0_12] : memref<4x16x4xf32, #tpu.memory_space<vmem>>, vector<1x16x4xf32>
    %18 = vector.shape_cast %17 : vector<1x16x4xf32> to vector<16x4xf32>
    %cst_13 = arith.constant dense<0.000000e+00> : vector<16x384xf32>
    %19 = tpu.matmul %18, %16, %cst_13 {dimension_numbers = #tpu.dot_dimension_numbers<[1], [0], [0], [1], [0, 0, 1, 1], [], []>} : vector<16x4xf32>, vector<4x384xf32>, vector<16x384xf32> -> vector<16x384xf32>
    %20 = arith.addf %15, %19 : vector<16x384xf32>
    %c1_14 = arith.constant 1 : index
    %c0_15 = arith.constant 0 : index
    %c0_16 = arith.constant 0 : index
    %21 = vector.load %arg1[%c1_14, %c0_15, %c0_16] : memref<2x4x512xf32, #tpu.memory_space<vmem>>, vector<1x4x512xf32>
    %22 = vector.shape_cast %21 : vector<1x4x512xf32> to vector<4x512xf32>
    %23 = vector.extract_strided_slice %22 {offsets = [0, 0], sizes = [4, 384], strides = [1, 1]} : vector<4x512xf32> to vector<4x384xf32>
    %c0_17 = arith.constant 0 : index
    %c0_18 = arith.constant 0 : index
    %c0_19 = arith.constant 0 : index
    %24 = vector.load %arg0[%c0_17, %c0_18, %c0_19] : memref<4x16x4xf32, #tpu.memory_space<vmem>>, vector<1x16x4xf32>
    %25 = vector.shape_cast %24 : vector<1x16x4xf32> to vector<16x4xf32>
    %cst_20 = arith.constant dense<0.000000e+00> : vector<16x384xf32>
    %26 = tpu.matmul %25, %23, %cst_20 {dimension_numbers = #tpu.dot_dimension_numbers<[1], [0], [0], [1], [0, 0, 1, 1], [], []>} : vector<16x4xf32>, vector<4x384xf32>, vector<16x384xf32> -> vector<16x384xf32>
    %27 = vector.extract_strided_slice %22 {offsets = [0, 1], sizes = [4, 384], strides = [1, 1]} : vector<4x512xf32> to vector<4x384xf32>
    %c1_21 = arith.constant 1 : index
    %c0_22 = arith.constant 0 : index
    %c0_23 = arith.constant 0 : index
    %28 = vector.load %arg0[%c1_21, %c0_22, %c0_23] : memref<4x16x4xf32, #tpu.memory_space<vmem>>, vector<1x16x4xf32>
    %29 = vector.shape_cast %28 : vector<1x16x4xf32> to vector<16x4xf32>
    %cst_24 = arith.constant dense<0.000000e+00> : vector<16x384xf32>
    %30 = tpu.matmul %29, %27, %cst_24 {dimension_numbers = #tpu.dot_dimension_numbers<[1], [0], [0], [1], [0, 0, 1, 1], [], []>} : vector<16x4xf32>, vector<4x384xf32>, vector<16x384xf32> -> vector<16x384xf32>
    %31 = arith.addf %26, %30 : vector<16x384xf32>
    %32 = vector.extract_strided_slice %22 {offsets = [0, 20], sizes = [4, 384], strides = [1, 1]} : vector<4x512xf32> to vector<4x384xf32>
    %c2_25 = arith.constant 2 : index
    %c0_26 = arith.constant 0 : index
    %c0_27 = arith.constant 0 : index
    %33 = vector.load %arg0[%c2_25, %c0_26, %c0_27] : memref<4x16x4xf32, #tpu.memory_space<vmem>>, vector<1x16x4xf32>
    %34 = vector.shape_cast %33 : vector<1x16x4xf32> to vector<16x4xf32>
    %cst_28 = arith.constant dense<0.000000e+00> : vector<16x384xf32>
    %35 = tpu.matmul %34, %32, %cst_28 {dimension_numbers = #tpu.dot_dimension_numbers<[1], [0], [0], [1], [0, 0, 1, 1], [], []>} : vector<16x4xf32>, vector<4x384xf32>, vector<16x384xf32> -> vector<16x384xf32>
    %36 = arith.addf %31, %35 : vector<16x384xf32>
    %37 = vector.extract_strided_slice %22 {offsets = [0, 21], sizes = [4, 384], strides = [1, 1]} : vector<4x512xf32> to vector<4x384xf32>
    %c3_29 = arith.constant 3 : index
    %c0_30 = arith.constant 0 : index
    %c0_31 = arith.constant 0 : index
    %38 = vector.load %arg0[%c3_29, %c0_30, %c0_31] : memref<4x16x4xf32, #tpu.memory_space<vmem>>, vector<1x16x4xf32>
    %39 = vector.shape_cast %38 : vector<1x16x4xf32> to vector<16x4xf32>
    %cst_32 = arith.constant dense<0.000000e+00> : vector<16x384xf32>
    %40 = tpu.matmul %39, %37, %cst_32 {dimension_numbers = #tpu.dot_dimension_numbers<[1], [0], [0], [1], [0, 0, 1, 1], [], []>} : vector<16x4xf32>, vector<4x384xf32>, vector<16x384xf32> -> vector<16x384xf32>
    %41 = arith.addf %36, %40 : vector<16x384xf32>
    %cst_33 = arith.constant dense<0.000000e+00> : vector<16xf32>
    %42 = vector.multi_reduction <add>, %20, %cst_33 [1] : vector<16x384xf32> to vector<16xf32>
    %43 = vector.shape_cast %42 : vector<16xf32> to vector<16x1xf32>
    %cst_34 = arith.constant 0.000000e+00 : f32
    %44 = vector.broadcast %cst_34 : f32 to vector<16x1xf32>
    %45 = arith.addf %44, %43 : vector<16x1xf32>
    %cst_35 = arith.constant dense<0.000000e+00> : vector<16xf32>
    %46 = vector.multi_reduction <add>, %41, %cst_35 [1] : vector<16x384xf32> to vector<16xf32>
    %47 = vector.shape_cast %46 : vector<16xf32> to vector<16x1xf32>
    %48 = arith.addf %45, %47 : vector<16x1xf32>
    %49 = arith.mulf %20, %20 : vector<16x384xf32>
    %cst_36 = arith.constant dense<0.000000e+00> : vector<16xf32>
    %50 = vector.multi_reduction <add>, %49, %cst_36 [1] : vector<16x384xf32> to vector<16xf32>
    %51 = vector.shape_cast %50 : vector<16xf32> to vector<16x1xf32>
    %cst_37 = arith.constant 0.000000e+00 : f32
    %52 = vector.broadcast %cst_37 : f32 to vector<16x1xf32>
    %53 = arith.addf %52, %51 : vector<16x1xf32>
    %54 = arith.mulf %41, %41 : vector<16x384xf32>
    %cst_38 = arith.constant dense<0.000000e+00> : vector<16xf32>
    %55 = vector.multi_reduction <add>, %54, %cst_38 [1] : vector<16x384xf32> to vector<16xf32>
    %56 = vector.shape_cast %55 : vector<16xf32> to vector<16x1xf32>
    %57 = arith.addf %53, %56 : vector<16x1xf32>
    %cst_39 = arith.constant 0.00138504151 : f32
    %58 = vector.broadcast %cst_39 : f32 to vector<16x1xf32>
    %59 = arith.mulf %48, %58 : vector<16x1xf32>
    %cst_40 = arith.constant 0.00138504151 : f32
    %60 = vector.broadcast %cst_40 : f32 to vector<16x1xf32>
    %61 = arith.mulf %57, %60 : vector<16x1xf32>
    %62 = arith.mulf %59, %59 : vector<16x1xf32>
    %63 = arith.subf %61, %62 : vector<16x1xf32>
    %cst_41 = arith.constant 0.000000e+00 : f32
    %64 = vector.broadcast %cst_41 : f32 to vector<16x1xf32>
    %65 = arith.maximumf %63, %64 : vector<16x1xf32>
    %c0_42 = arith.constant 0 : index
    %c0_43 = arith.constant 0 : index
    %66 = vector.load %arg2[%c0_42, %c0_43] : memref<16x1xf32, #tpu.memory_space<vmem>>, vector<16x1xf32>
    %cst_44 = arith.constant 9.99999974E-6 : f32
    %67 = vector.broadcast %cst_44 : f32 to vector<16x1xf32>
    %68 = arith.addf %65, %67 : vector<16x1xf32>
    %69 = math.rsqrt %68 : vector<16x1xf32>
    %70 = arith.mulf %66, %69 : vector<16x1xf32>
    %c0_45 = arith.constant 0 : index
    %c0_46 = arith.constant 0 : index
    %71 = vector.load %arg3[%c0_45, %c0_46] : memref<16x1xf32, #tpu.memory_space<vmem>>, vector<16x1xf32>
    %72 = arith.mulf %70, %59 : vector<16x1xf32>
    %73 = arith.subf %71, %72 : vector<16x1xf32>
    %74 = vector.broadcast %70 : vector<16x1xf32> to vector<16x384xf32>
    %75 = arith.mulf %20, %74 : vector<16x384xf32>
    %76 = vector.broadcast %73 : vector<16x1xf32> to vector<16x384xf32>
    %77 = arith.addf %75, %76 : vector<16x384xf32>
    %cst_47 = arith.constant 0.000000e+00 : f32
    %78 = vector.broadcast %cst_47 : f32 to vector<16x384xf32>
    %79 = arith.maximumf %77, %78 : vector<16x384xf32>
    %c0_48 = arith.constant 0 : index
    %c0_49 = arith.constant 0 : index
    %c0_50 = arith.constant 0 : index
    %80 = vector.load %arg4[%c0_48, %c0_49, %c0_50] : memref<2x16x384xf32, #tpu.memory_space<vmem>>, vector<1x16x384xf32>
    %81 = vector.shape_cast %80 : vector<1x16x384xf32> to vector<16x384xf32>
    %82 = vector.shape_cast %79 : vector<16x384xf32> to vector<1x16x384xf32>
    tpu.vector_store %arg4[%c0_48, %c0_49, %c0_50], %82 {strides = array<i32>} : memref<2x16x384xf32, #tpu.memory_space<vmem>>, vector<1x16x384xf32>,
    %83 = vector.broadcast %70 : vector<16x1xf32> to vector<16x384xf32>
    %84 = arith.mulf %41, %83 : vector<16x384xf32>
    %85 = vector.broadcast %73 : vector<16x1xf32> to vector<16x384xf32>
    %86 = arith.addf %84, %85 : vector<16x384xf32>
    %cst_51 = arith.constant 0.000000e+00 : f32
    %87 = vector.broadcast %cst_51 : f32 to vector<16x384xf32>
    %88 = arith.maximumf %86, %87 : vector<16x384xf32>
    %c1_52 = arith.constant 1 : index
    %c0_53 = arith.constant 0 : index
    %c0_54 = arith.constant 0 : index
    %89 = vector.load %arg4[%c1_52, %c0_53, %c0_54] : memref<2x16x384xf32, #tpu.memory_space<vmem>>, vector<1x16x384xf32>
    %90 = vector.shape_cast %89 : vector<1x16x384xf32> to vector<16x384xf32>
    %91 = vector.shape_cast %88 : vector<16x384xf32> to vector<1x16x384xf32>
    tpu.vector_store %arg4[%c1_52, %c0_53, %c0_54], %91 {strides = array<i32>} : memref<2x16x384xf32, #tpu.memory_space<vmem>>, vector<1x16x384xf32>,
    return
  }
}

</mosaic_0001>

<bundles_post_ra>
// kernel: cnn_encoder_forward.1
= control target key start
LH: loop header
LB: loop body
LE: loop exit
PB: predicated region body
PF: predicated region fallthrough
CT: control target
= control target key end

     0   :  { %s1074_s19 = smov 127   ;;  %s1075_s20 = smov 108   ;;  %vm52_vm0 = vcmask 1043456   ;;  %vm45_vm1 = vcmask 31744   ;;  %vm41_vm2 = vcmask 1039360   ;;  %vm233_vm3 = vcmask 883712   ;;  %s1447_s1 = inlined_call_operand.vmem [shape: f32[2,4,512], index: 1, kind: input, shape index: {}]   ;;  %s1448_s0 = inlined_call_operand.vmem [shape: f32[4,16,4], index: 0, kind: input, shape index: {}]   ;;  %s1449_s2 = inlined_call_operand.vmem [shape: f32[16,1], index: 2, kind: input, shape index: {}]   ;;  %s1450_s3 = inlined_call_operand.vmem [shape: f32[16,1], index: 3, kind: input, shape index: {}]   ;;  %s1451_s4 = inlined_call_operand.vmem [shape: f32[2,16,384], index: 4, kind: output, shape index: {}]  }
   0x1   :  { %v18_v0 = vld [vmem:[%s1447_s1 + $0x8] sm:$0xff]  ;;  %v17_v1 = vld [vmem:[%s1447_s1] sm:$0xff]  ;;  %v1020_v13 = vld [vmem:[%s1447_s1 + $0x18] sm:$0xff]  ;;  %s1076_s25 = smov 107   ;;  %vm342_vm4 = vcmask 875520  }
   0x2   :  { %28 = vst [vmem:[#allocation1 + $0x10] ss:$2 sm:$0xff] %v18_v0  ;;  %v1019_v14 = vld [vmem:[%s1447_s1 + $0x10] sm:$0xff]  ;;  %v1154_v34 = vld [vmem:[%s1448_s0] sm:$0xff]  ;;  %v1163_v35 = vld [vmem:[%s1448_s0 + $0x8] sm:$0xff] }
   0x3   :  { %26 = vst [vmem:[#allocation1] ss:$2 sm:$0xff] %v17_v1  ;;  %v1171_v43 = vld [vmem:[%s1448_s0 + $0x10] sm:$0xff]  ;;  %v1193_v49 = vld [vmem:[%s1448_s0 + $0x20] sm:$0xff]  ;;  %v1199_v51 = vld [vmem:[%s1448_s0 + $0x18] sm:$0xff] }
   0x4   :  { %v1213_v54 = vld [vmem:[%s1448_s0 + $0x28] sm:$0xff]  ;;  %v1234_v61 = vld [vmem:[%s1448_s0 + $0x30] sm:$0xff] }
   0x9   :  { %v31_v2 = vld.sshfl [vmem:[#allocation1 + $0x10] sm:$0xff pattern:$0x75316420]  ;;  %v32_v3 = vld.sshfl [vmem:[#allocation1 + $0x18] sm:$0xff pattern:$0x75316420] }
   0xa   :  { %37 = vrot.lane.b32.xlu0 %v31_v2, %s1074_s19  ;;  %v29_v4 = vld.sshfl [vmem:[#allocation1] sm:$0xff pattern:$0x75316420]  ;;  %130 = vst [vmem:[#allocation1 + $0x10] ss:$2 sm:$0xff] %v18_v0  ;;  %v1009_v2 = vld [vmem:[%s1448_s0 + $0x38] sm:$0xff] }
   0xb   :  { %33 = vrot.lane.b32.xlu1 %v29_v4, %s1074_s19  ;;  %v30_v5 = vld.sshfl [vmem:[#allocation1 + $0x8] sm:$0xff pattern:$0x75316420] }
   0xc   :  { %128 = vst [vmem:[#allocation1] ss:$2 sm:$0xff] %v17_v1 }
  0x11   :  { %v1111_v6 = vld.sshfl [vmem:[#allocation1 + $0x10] sm:$0xff pattern:$0x75316420] }
  0x12   :  { %39 = vrot.lane.b32.xlu0 %v32_v3, %s1074_s19  ;;  %220 = vst [vmem:[#allocation1 + $0x10] ss:$2 sm:$0xff] %v18_v0 }
  0x13   :  { %35 = vrot.lane.b32.xlu1 %v30_v5, %s1074_s19  ;;  %v1115_v7 = vld.sshfl [vmem:[#allocation1] sm:$0xff pattern:$0x75316420]  ;;  %v1117_v8 = vld.sshfl [vmem:[#allocation1 + $0x8] sm:$0xff pattern:$0x75316420] }
  0x14   :  { %218 = vst [vmem:[#allocation1] ss:$2 sm:$0xff] %v17_v1  ;;  %988 = vmatpush.msk.msra.mxu3 %vm52_vm0, %v1115_v7 }
  0x15   :  { %989 = vmatmul.msk.f32.vlgmr.msra.gmra.mxu3 %vm45_vm1, %v1154_v34 }
  0x19   :  { %v223_v9 = vld.sshfl [vmem:[#allocation1 + $0x10] sm:$0xff pattern:$0x75316420]  ;;  %v224_v10 = vld.sshfl [vmem:[#allocation1 + $0x18] sm:$0xff pattern:$0x75316420] }
  0x1a   :  { %229 = vrot.lane.b32.xlu0 %v223_v9, %s1075_s20  ;;  %329 = vst [vmem:[#allocation1 + $0x10] ss:$2 sm:$0xff] %v18_v0 }
  0x1b   :  { %v221_v11 = vld.sshfl [vmem:[#allocation1] sm:$0xff pattern:$0x75316420]  ;;  %v222_v12 = vld.sshfl [vmem:[#allocation1 + $0x8] sm:$0xff pattern:$0x75316420] }
  0x1c   :  { %225 = vrot.lane.b32.xlu2 %v221_v11, %s1075_s20  ;;  %327 = vst [vmem:[#allocation1] ss:$2 sm:$0xff] %v17_v1 }
  0x1d   :  { %990 = vmatmul.msk.f32.gmra.mxu3 %vm45_vm1, %v1163_v35 }
  0x21   :  { %v333_v15 = vld.sshfl [vmem:[#allocation1 + $0x18] sm:$0xff pattern:$0x75316420]  ;;  %v332_v16 = vld.sshfl [vmem:[#allocation1 + $0x10] sm:$0xff pattern:$0x75316420] }
  0x22   :  { %340 = vrot.lane.b32.xlu0 %v333_v15, %s1076_s25  ;;  %440 = vst [vmem:[#allocation1 + $0x10] ss:$2 sm:$0xff] %v1020_v13 }
  0x23   :  { %v331_v17 = vld.sshfl [vmem:[#allocation1 + $0x8] sm:$0xff pattern:$0x75316420]  ;;  %v330_v18 = vld.sshfl [vmem:[#allocation1] sm:$0xff pattern:$0x75316420] }
  0x24   :  { %336 = vrot.lane.b32.xlu1 %v331_v17, %s1076_s25  ;;  %438 = vst [vmem:[#allocation1] ss:$2 sm:$0xff] %v1019_v14  ;;  %227 = vrot.lane.b32.xlu2 %v222_v12, %s1075_s20 }
  0x29   :  { %v443_v19 = vld.sshfl [vmem:[#allocation1 + $0x10] sm:$0xff pattern:$0x75316420]  ;;  %v444_v20 = vld.sshfl [vmem:[#allocation1 + $0x18] sm:$0xff pattern:$0x75316420] }
  0x2a   :  { %449 = vrot.lane.b32.xlu0 %v443_v19, %s1074_s19  ;;  %533 = vst [vmem:[#allocation1 + $0x10] ss:$2 sm:$0xff] %v1020_v13 }
  0x2b   :  { %v441_v21 = vld.sshfl [vmem:[#allocation1] sm:$0xff pattern:$0x75316420]  ;;  %v442_v22 = vld.sshfl [vmem:[#allocation1 + $0x8] sm:$0xff pattern:$0x75316420] }
  0x2c   :  { %231 = vrot.lane.b32.xlu1 %v224_v10, %s1075_s20  ;;  %338 = vrot.lane.b32.xlu2 %v332_v16, %s1076_s25  ;;  %531 = vst [vmem:[#allocation1] ss:$2 sm:$0xff] %v1019_v14 }
  0x31   :  { %v1133_v23 = vld.sshfl [vmem:[#allocation1 + $0x10] sm:$0xff pattern:$0x75316420] }
  0x32   :  { %614 = vst [vmem:[#allocation1 + $0x10] ss:$2 sm:$0xff] %v1020_v13  ;;  %447 = vrot.lane.b32.xlu0 %v442_v22, %s1074_s19 }
  0x33   :  { %v1136_v24 = vld.sshfl [vmem:[#allocation1] sm:$0xff pattern:$0x75316420]  ;;  %v1138_v25 = vld.sshfl [vmem:[#allocation1 + $0x8] sm:$0xff pattern:$0x75316420] }
  0x34   :  { %451 = vrot.lane.b32.xlu1 %v444_v20, %s1074_s19  ;;  %612 = vst [vmem:[#allocation1] ss:$2 sm:$0xff] %v1019_v14  ;;  %334 = vrot.lane.b32.xlu2 %v330_v18, %s1076_s25 }
  0x39   :  { %v617_v26 = vld.sshfl [vmem:[#allocation1 + $0x10] sm:$0xff pattern:$0x75316420]  ;;  %v618_v27 = vld.sshfl [vmem:[#allocation1 + $0x18] sm:$0xff pattern:$0x75316420] }
  0x3a   :  { %623 = vrot.lane.b32.xlu0 %v617_v26, %s1075_s20  ;;  %713 = vst [vmem:[#allocation1 + $0x10] ss:$2 sm:$0xff] %v1020_v13 }
  0x3b   :  { %v615_v28 = vld.sshfl [vmem:[#allocation1] sm:$0xff pattern:$0x75316420]  ;;  %v616_v29 = vld.sshfl [vmem:[#allocation1 + $0x8] sm:$0xff pattern:$0x75316420] }
  0x3c   :  { %619 = vrot.lane.b32.xlu1 %v615_v28, %s1075_s20  ;;  %711 = vst [vmem:[#allocation1] ss:$2 sm:$0xff] %v1019_v14  ;;  %445 = vrot.lane.b32.xlu2 %v441_v21, %s1074_s19 }
  0x41   :  { %v717_v30 = vld.sshfl [vmem:[#allocation1 + $0x18] sm:$0xff pattern:$0x75316420]  ;;  %v716_v32 = vld.sshfl [vmem:[#allocation1 + $0x10] sm:$0xff pattern:$0x75316420] }
  0x42   :  { %724 = vrot.lane.b32.xlu0 %v717_v30, %s1076_s25 }
  0x43   :  { %v715_v31 = vld.sshfl [vmem:[#allocation1 + $0x8] sm:$0xff pattern:$0x75316420]  ;;  %v714_v33 = vld.sshfl [vmem:[#allocation1] sm:$0xff pattern:$0x75316420] }
  0x44   :  { %720 = vrot.lane.b32.xlu1 %v715_v31, %s1076_s25  ;;  %621 = vrot.lane.b32.xlu2 %v616_v29, %s1075_s20 }
  0x4c   :  { %625 = vrot.lane.b32.xlu1 %v618_v27, %s1075_s20  ;;  %722 = vrot.lane.b32.xlu2 %v716_v32, %s1076_s25 }
  0x54   :  { %718 = vrot.lane.b32.xlu2 %v714_v33, %s1076_s25 }
  0x76   :  { %v226_v36 = vpop.permute.xlu2 %225 }
  0x7c   :  { %v38_v37 = vpop.permute.xlu0 %37 }
  0x7d   :  { %v34_v38 = vpop.permute.xlu1 %33 }
  0x7e   :  { %v228_v39 = vpop.permute.xlu2 %227 }
  0x7f   :  { %v234_v46 = vsel %vm233_vm3, %v226_v36, %v228_v39 }
  0x84   :  { %v40_v40 = vpop.permute.xlu0 %39 }
  0x85   :  { %v36_v41 = vpop.permute.xlu1 %35  ;;  %v44_v42 = vsel %vm41_vm2, %v38_v37, %v40_v40 }
  0x86   :  { %v42_v44 = vsel %vm41_vm2, %v34_v38, %v36_v41  ;;  %v43_v45 = vsel %vm41_vm2, %v36_v41, %v38_v37  ;;  %985 = vmatpush.msk.msra.mxu2 %vm52_vm0, %v44_v42  ;;  %v339_v47 = vpop.permute.xlu2 %338 }
  0x87   :  { %979 = vmatpush.msk.msra.mxu0 %vm52_vm0, %v42_v44  ;;  %982 = vmatpush.msk.msra.mxu1 %vm52_vm0, %v43_v45 }
  0x88   :  { %980 = vmatmul.msk.f32.vlgmr.msra.gmra.mxu0 %vm45_vm1, %v1171_v43  ;;  %983 = vmatmul.msk.f32.vlgmr.msra.gmra.mxu1 %vm45_vm1, %v1171_v43 }
  0x89   :  { %986 = vmatmul.msk.f32.vlgmr.msra.gmra.mxu2 %vm45_vm1, %v1171_v43  ;;  %991 = vmatpush.msk.msrb.mxu0 %vm52_vm0, %v1117_v8 }
  0x8a   :  { %999 = vmatpush.msk.msrb.mxu2 %vm52_vm0, %v234_v46  ;;  %994 = vmatpush.msk.msrb.mxu1 %vm52_vm0, %v1111_v6 }
  0x8c   :  { %v230_v48 = vpop.permute.xlu0 %229 }
  0x8d   :  { %v235_v50 = vsel %vm233_vm3, %v228_v39, %v230_v48 }
  0x8e   :  { %1002 = vmatpush.msk.msrb.mxu3 %vm52_vm0, %v235_v50  ;;  %v335_v52 = vpop.permute.xlu2 %334 }
  0x8f   :  { %1003 = vmatmul.msk.f32.vlgmr.msrb.gmra.mxu3 %vm45_vm1, %v1193_v49 }
  0x90   :  { %981 = vmatmul.msk.f32.gmra.mxu0 %vm45_vm1, %v1199_v51  ;;  %984 = vmatmul.msk.f32.gmra.mxu1 %vm45_vm1, %v1199_v51 }
  0x91   :  { %987 = vmatmul.msk.f32.gmra.mxu2 %vm45_vm1, %v1199_v51 }
  0x94   :  { %v341_v53 = vpop.permute.xlu0 %340 }
  0x95   :  { %v345_v55 = vsel %vm342_vm4, %v339_v47, %v341_v53 }
  0x96   :  { %v337_v56 = vpop.permute.xlu1 %336  ;;  %1016 = vmatpush.msk.msra.mxu3 %vm52_vm0, %v345_v55  ;;  %v446_v59 = vpop.permute.xlu2 %445 }
  0x97   :  { %v344_v57 = vsel %vm342_vm4, %v337_v56, %v339_v47  ;;  %v343_v58 = vsel %vm342_vm4, %v335_v52, %v337_v56  ;;  %1004 = vmatmul.msk.f32.gmra.mxu3 %vm45_vm1, %v1213_v54 }
  0x98   :  { %992 = vmatmul.msk.f32.vlgmr.msrb.gmra.mxu0 %vm45_vm1, %v1154_v34  ;;  %995 = vmatmul.msk.f32.vlgmr.msrb.gmra.mxu1 %vm45_vm1, %v1154_v34  ;;  %v163_v20 = vpop.f32.mrf.mxu3 }
  0x99   :  { %1000 = vmatmul.msk.f32.vlgmr.msrb.gmra.mxu2 %vm45_vm1, %v1193_v49  ;;  %1010 = vmatpush.msk.msra.mxu1 %vm52_vm0, %v343_v58 }
  0x9a   :  { %1013 = vmatpush.msk.msra.mxu2 %vm52_vm0, %v344_v57  ;;  %1030 = vmatpush.msk.msrb.mxu3 %vm52_vm0, %v1136_v24 }
  0x9c   :  { %v450_v60 = vpop.permute.xlu0 %449 }
  0x9e   :  { %v232_v62 = vpop.permute.xlu1 %231  ;;  %v622_v0 = vpop.permute.xlu2 %621 }
  0x9f   :  { %v236_v63 = vsel %vm233_vm3, %v230_v48, %v232_v62  ;;  %1017 = vmatmul.msk.f32.vlgmr.msra.gmra.mxu3 %vm45_vm1, %v1234_v61 }
  0xa0   :  { %1005 = vmatpush.msk.msra.mxu0 %vm52_vm0, %v236_v63  ;;  %996 = vmatmul.msk.f32.gmra.mxu1 %vm45_vm1, %v1163_v35 }
  0xa1   :  { %993 = vmatmul.msk.f32.gmra.mxu0 %vm45_vm1, %v1163_v35  ;;  %1001 = vmatmul.msk.f32.gmra.mxu2 %vm45_vm1, %v1213_v54 }
  0xa4   :  { %v448_v1 = vpop.permute.xlu0 %447 }
  0xa5   :  { %v454_v3 = vsel %vm41_vm2, %v448_v1, %v450_v60  ;;  %v453_v4 = vsel %vm41_vm2, %v446_v59, %v448_v1 }
  0xa6   :  { %v452_v5 = vpop.permute.xlu1 %451  ;;  %1024 = vmatpush.msk.msrb.mxu1 %vm52_vm0, %v454_v3  ;;  %1021 = vmatpush.msk.msrb.mxu0 %vm52_vm0, %v453_v4  ;;  %v723_v7 = vpop.permute.xlu2 %722 }
  0xa7   :  { %v455_v6 = vsel %vm41_vm2, %v450_v60, %v452_v5  ;;  %1018 = vmatmul.msk.f32.gmra.mxu3 %vm45_vm1, %v1009_v2 }
  0xa8   :  { %1011 = vmatmul.msk.f32.vlgmr.msra.gmra.mxu1 %vm45_vm1, %v1234_v61  ;;  %1027 = vmatpush.msk.msrb.mxu2 %vm52_vm0, %v455_v6 }
  0xa9   :  { %1006 = vmatmul.msk.f32.vlgmr.msra.gmra.mxu0 %vm45_vm1, %v1193_v49  ;;  %1014 = vmatmul.msk.f32.vlgmr.msra.gmra.mxu2 %vm45_vm1, %v1234_v61 }
  0xaa   :  { %1033 = vmatpush.msk.msra.mxu0 %vm52_vm0, %v1138_v25  ;;  %1036 = vmatpush.msk.msra.mxu1 %vm52_vm0, %v1133_v23  ;;  %v166_v23 = vpop.f32.mrf.mxu3 }
  0xac   :  { %v624_v8 = vpop.permute.xlu0 %623 }
  0xad   :  { %v628_v9 = vsel %vm233_vm3, %v622_v0, %v624_v8 }
  0xae   :  { %v620_v10 = vpop.permute.xlu1 %619  ;;  %1042 = vmatpush.msk.msra.mxu3 %vm52_vm0, %v628_v9  ;;  %v719_v13 = vpop.permute.xlu2 %718 }
  0xaf   :  { %1031 = vmatmul.msk.f32.vlgmr.msrb.gmra.mxu3 %vm45_vm1, %v1154_v34  ;;  %v627_v11 = vsel %vm233_vm3, %v620_v10, %v622_v0 }
  0xb0   :  { %1012 = vmatmul.msk.f32.gmra.mxu1 %vm45_vm1, %v1009_v2  ;;  %1039 = vmatpush.msk.msra.mxu2 %vm52_vm0, %v627_v11 }
  0xb1   :  { %1007 = vmatmul.msk.f32.gmra.mxu0 %vm45_vm1, %v1213_v54  ;;  %1015 = vmatmul.msk.f32.gmra.mxu2 %vm45_vm1, %v1009_v2 }
  0xb4   :  { %v725_v12 = vpop.permute.xlu0 %724 }
  0xb5   :  { %v728_v14 = vsel %vm342_vm4, %v723_v7, %v725_v12 }
  0xb6   :  { %v721_v15 = vpop.permute.xlu1 %720  ;;  %1054 = vmatpush.msk.msrb.mxu3 %vm52_vm0, %v728_v14 }
  0xb7   :  { %1032 = vmatmul.msk.f32.gmra.mxu3 %vm45_vm1, %v1163_v35  ;;  %v727_v16 = vsel %vm342_vm4, %v721_v15, %v723_v7  ;;  %v726_v17 = vsel %vm342_vm4, %v719_v13, %v721_v15 }
  0xb8   :  { %1025 = vmatmul.msk.f32.vlgmr.msrb.gmra.mxu1 %vm45_vm1, %v1171_v43 }
  0xb9   :  { %1022 = vmatmul.msk.f32.vlgmr.msrb.gmra.mxu0 %vm45_vm1, %v1171_v43  ;;  %1028 = vmatmul.msk.f32.vlgmr.msrb.gmra.mxu2 %vm45_vm1, %v1171_v43 }
  0xba   :  { %1048 = vmatpush.msk.msrb.mxu1 %vm52_vm0, %v726_v17  ;;  %1051 = vmatpush.msk.msrb.mxu2 %vm52_vm0, %v727_v16 }
  0xbe   :  { %v626_v18 = vpop.permute.xlu1 %625 }
  0xbf   :  { %v629_v19 = vsel %vm233_vm3, %v624_v8, %v626_v18  ;;  %1043 = vmatmul.msk.f32.vlgmr.msra.gmra.mxu3 %vm45_vm1, %v1193_v49 }
  0xc0   :  { %1045 = vmatpush.msk.msrb.mxu0 %vm52_vm0, %v629_v19  ;;  %1026 = vmatmul.msk.f32.gmra.mxu1 %vm45_vm1, %v1199_v51 }
  0xc1   :  { %1023 = vmatmul.msk.f32.gmra.mxu0 %vm45_vm1, %v1199_v51  ;;  %1029 = vmatmul.msk.f32.gmra.mxu2 %vm45_vm1, %v1199_v51 }
  0xc7   :  { %1044 = vmatmul.msk.f32.gmra.mxu3 %vm45_vm1, %v1213_v54 }
  0xc8   :  { %1037 = vmatmul.msk.f32.vlgmr.msra.gmra.mxu1 %vm45_vm1, %v1154_v34 }
  0xc9   :  { %1034 = vmatmul.msk.f32.vlgmr.msra.gmra.mxu0 %vm45_vm1, %v1154_v34  ;;  %1040 = vmatmul.msk.f32.vlgmr.msra.gmra.mxu2 %vm45_vm1, %v1193_v49 }
  0xcf   :  { %1055 = vmatmul.msk.f32.vlgmr.msrb.gmra.mxu3 %vm45_vm1, %v1234_v61 }
  0xd0   :  { %1038 = vmatmul.msk.f32.gmra.mxu1 %vm45_vm1, %v1163_v35 }
  0xd1   :  { %1035 = vmatmul.msk.f32.gmra.mxu0 %vm45_vm1, %v1163_v35  ;;  %1041 = vmatmul.msk.f32.gmra.mxu2 %vm45_vm1, %v1213_v54 }
  0xd7   :  { %1056 = vmatmul.msk.f32.gmra.mxu3 %vm45_vm1, %v1009_v2 }
  0xd8   :  { %1049 = vmatmul.msk.f32.vlgmr.msrb.gmra.mxu1 %vm45_vm1, %v1234_v61 }
  0xd9   :  { %1046 = vmatmul.msk.f32.vlgmr.msrb.gmra.mxu0 %vm45_vm1, %v1193_v49  ;;  %1052 = vmatmul.msk.f32.vlgmr.msrb.gmra.mxu2 %vm45_vm1, %v1234_v61 }
  0xe0   :  { %1050 = vmatmul.msk.f32.gmra.mxu1 %vm45_vm1, %v1009_v2 }
  0xe1   :  { %1047 = vmatmul.msk.f32.gmra.mxu0 %vm45_vm1, %v1213_v54  ;;  %1053 = vmatmul.msk.f32.gmra.mxu2 %vm45_vm1, %v1009_v2 }
 0x105   :  { %v76_v21 = vpop.f32.mrf.mxu0  ;;  %v99_v22 = vpop.f32.mrf.mxu1 }
 0x106   :  { %v164_v40 = vadd.f32 %v163_v20, %v76_v21 }
 0x10c   :  { %v122_v24 = vpop.f32.mrf.mxu2 }
 0x10d   :  { %v79_v25 = vpop.f32.mrf.mxu0  ;;  %v102_v26 = vpop.f32.mrf.mxu1 }
 0x10e   :  { %v167_v54 = vadd.f32 %v166_v23, %v79_v25 }
 0x112   :  { %v289_v27 = vpop.f32.mrf.mxu3 }
 0x114   :  { %v125_v28 = vpop.f32.mrf.mxu2 }
 0x115   :  { %v186_v29 = vpop.f32.mrf.mxu0  ;;  %v209_v30 = vpop.f32.mrf.mxu1 }
 0x116   :  { %v187_v39 = vadd.f32 %v186_v29, %v99_v22  ;;  %v210_v41 = vadd.f32 %v209_v30, %v122_v24 }
 0x118   :  { %v319_v43 = vadd.f32 %v289_v27, %v187_v39 }
 0x11a   :  { %v292_v31 = vpop.f32.mrf.mxu3 }
 0x11c   :  { %v266_v32 = vpop.f32.mrf.mxu2 }
 0x11d   :  { %v212_v33 = vpop.f32.mrf.mxu1  ;;  %v318_v44 = vadd.f32 %v266_v32, %v164_v40 }
 0x11e   :  { %v189_v34 = vpop.f32.mrf.mxu0  ;;  %v213_v55 = vadd.f32 %v212_v33, %v125_v28 }
 0x11f   :  { %v190_v51 = vadd.f32 %v189_v34, %v102_v26 }
 0x121   :  { %v322_v59 = vadd.f32 %v292_v31, %v190_v51 }
 0x122   :  { %v421_v35 = vpop.f32.mrf.mxu3 }
 0x124   :  { %v269_v36 = vpop.f32.mrf.mxu2 }
 0x125   :  { %v375_v37 = vpop.f32.mrf.mxu1  ;;  %v321_v60 = vadd.f32 %v269_v36, %v167_v54 }
 0x126   :  { %v312_v38 = vpop.f32.mrf.mxu0  ;;  %v1327_v47 = vadd.f32 %v375_v37, %v318_v44 }
 0x127   :  { %v320_v45 = vadd.f32 %v312_v38, %v210_v41 }
 0x128   :  { %v830_v61 = vmul.f32 %v1327_v47, %v1327_v47 }
 0x129   :  { %v1331_v52 = vadd.f32 %v421_v35, %v320_v45 }
 0x12a   :  { %v424_v42 = vpop.f32.mrf.mxu3 }
 0x12b   :  { %v832_v7 = vmul.f32 %v1331_v52, %v1331_v52 }
 0x12c   :  { %v398_v46 = vpop.f32.mrf.mxu2 }
 0x12d   :  { %v1329_v48 = vadd.f32 %v398_v46, %v319_v43  ;;  %v378_v49 = vpop.f32.mrf.mxu1 }
 0x12e   :  { %v315_v50 = vpop.f32.mrf.mxu0  ;;  %v1340_v0 = vadd.f32 %v378_v49, %v321_v60 }
 0x12f   :  { %v810_v53 = vadd.f32 %v1329_v48, %v1327_v47  ;;  %v831_v56 = vmul.f32 %v1329_v48, %v1329_v48  ;;  %v323_v62 = vadd.f32 %v315_v50, %v213_v55 }
 0x130   :  { %v833_v12 = vmul.f32 %v1340_v0, %v1340_v0 }
 0x131   :  { %v811_v57 = vadd.f32 %v810_v53, %v1331_v52  ;;  %v836_v3 = vadd.f32 %v831_v56, %v830_v61  ;;  %v1344_v5 = vadd.f32 %v424_v42, %v323_v62 }
 0x132   :  { %v560_v58 = vpop.f32.mrf.mxu3 }
 0x133   :  { %812 = vadd.xlane.f32.xlu0 %v811_v57  ;;  %v837_v10 = vadd.f32 %v836_v3, %v832_v7  ;;  %v835_v17 = vmul.f32 %v1344_v5, %v1344_v5 }
 0x134   :  { %v401_v63 = vpop.f32.mrf.mxu2 }
 0x135   :  { %v1342_v1 = vadd.f32 %v401_v63, %v322_v59  ;;  %v502_v2 = vpop.f32.mrf.mxu1 }
 0x136   :  { %v479_v4 = vpop.f32.mrf.mxu0 }
 0x137   :  { %v814_v6 = vadd.f32 %v1342_v1, %v1340_v0  ;;  %v834_v8 = vmul.f32 %v1342_v1, %v1342_v1  ;;  %v561_v32 = vadd.f32 %v560_v58, %v479_v4 }
 0x139   :  { %v815_v9 = vadd.f32 %v814_v6, %v1344_v5  ;;  %v840_v15 = vadd.f32 %v834_v8, %v833_v12 }
 0x13a   :  { %v563_v11 = vpop.f32.mrf.mxu3 }
 0x13b   :  { %816 = vadd.xlane.f32.xlu1 %v815_v9  ;;  %838 = vadd.xlane.f32.xlu0 %v837_v10  ;;  %v841_v18 = vadd.f32 %v840_v15, %v835_v17 }
 0x13c   :  { %v525_v13 = vpop.f32.mrf.mxu2 }
 0x13d   :  { %v505_v14 = vpop.f32.mrf.mxu1 }
 0x13e   :  { %v482_v16 = vpop.f32.mrf.mxu0 }
 0x13f   :  { %v564_v40 = vadd.f32 %v563_v11, %v482_v16 }
 0x142   :  { %v676_v20 = vpop.f32.mrf.mxu3 }
 0x143   :  { %842 = vadd.xlane.f32.xlu1 %v841_v18 }
 0x144   :  { %v528_v19 = vpop.f32.mrf.mxu2 }
 0x145   :  { %v606_v21 = vpop.f32.mrf.mxu1 }
 0x146   :  { %v583_v22 = vpop.f32.mrf.mxu0  ;;  %v607_v33 = vadd.f32 %v606_v21, %v525_v13 }
 0x147   :  { %v584_v30 = vadd.f32 %v583_v22, %v502_v2 }
 0x149   :  { %v706_v34 = vadd.f32 %v676_v20, %v584_v30 }
 0x14a   :  { %v679_v26 = vpop.f32.mrf.mxu3 }
 0x14c   :  { %v653_v23 = vpop.f32.mrf.mxu2 }
 0x14d   :  { %v609_v24 = vpop.f32.mrf.mxu1  ;;  %v705_v35 = vadd.f32 %v653_v23, %v561_v32 }
 0x14e   :  { %v586_v25 = vpop.f32.mrf.mxu0  ;;  %v610_v43 = vadd.f32 %v609_v24, %v528_v19 }
 0x14f   :  { %v587_v42 = vadd.f32 %v586_v25, %v505_v14  ;;  %v1077_v14 = vmov 0  }
 0x150   :  { %1068 = vset.pattern.permute.xlu2 %v1077_v14  ;;  %1067 = vset.pattern.permute.xlu1 %v1077_v14 }
 0x151   :  { %v709_v54 = vadd.f32 %v679_v26, %v587_v42  ;;  %1069 = vset.pattern.permute.xlu0 %v1077_v14 }
 0x152   :  { %v798_v31 = vpop.f32.mrf.mxu3 }
 0x154   :  { %v656_v27 = vpop.f32.mrf.mxu2 }
 0x155   :  { %v752_v29 = vpop.f32.mrf.mxu1  ;;  %v708_v49 = vadd.f32 %v656_v27, %v564_v40 }
 0x156   :  { %v699_v28 = vpop.f32.mrf.mxu0  ;;  %v1357_v38 = vadd.f32 %v752_v29, %v705_v35 }
 0x157   :  { %v707_v36 = vadd.f32 %v699_v28, %v607_v33 }
 0x158   :  { %v846_v4 = vmul.f32 %v1357_v38, %v1357_v38 }
 0x159   :  { %v1361_v44 = vadd.f32 %v798_v31, %v707_v36 }
 0x15a   :  { %v801_v53 = vpop.f32.mrf.mxu3 }
 0x15b   :  { %v848_v8 = vmul.f32 %v1361_v44, %v1361_v44 }
 0x15c   :  { %v775_v37 = vpop.f32.mrf.mxu2 }
 0x15d   :  { %v1359_v39 = vadd.f32 %v775_v37, %v706_v34  ;;  %v755_v46 = vpop.f32.mrf.mxu1 }
 0x15e   :  { %v702_v41 = vpop.f32.mrf.mxu0  ;;  %v1366_v55 = vadd.f32 %v755_v46, %v708_v49  ;;  %v873_v46 = vld [vmem:[%s1449_s2 + $0x8] sm:$0xff] }
 0x15f   :  { %v820_v45 = vadd.f32 %v1359_v39, %v1357_v38  ;;  %v710_v50 = vadd.f32 %v702_v41, %v610_v43  ;;  %v847_v62 = vmul.f32 %v1359_v39, %v1359_v39 }
 0x160   :  { %v849_v59 = vmul.f32 %v1366_v55, %v1366_v55 }
 0x161   :  { %v821_v51 = vadd.f32 %v820_v45, %v1361_v44  ;;  %v1368_v57 = vadd.f32 %v801_v53, %v710_v50  ;;  %v852_v7 = vadd.f32 %v847_v62, %v846_v4  ;;  %v898_v62 = vld [vmem:[%s1450_s3] sm:$0xff]  ;;  %v899_v4 = vld [vmem:[%s1450_s3 + $0x8] sm:$0xff] }
 0x163   :  { %822 = vadd.xlane.f32.xlu2 %v821_v51  ;;  %v851_v2 = vmul.f32 %v1368_v57, %v1368_v57  ;;  %v853_v9 = vadd.f32 %v852_v7, %v848_v8 }
 0x164   :  { %v778_v56 = vpop.f32.mrf.mxu2 }
 0x165   :  { %v1370_v58 = vadd.f32 %v778_v56, %v709_v54  ;;  %v872_v56 = vld [vmem:[%s1449_s2] sm:$0xff] }
 0x167   :  { %v850_v60 = vmul.f32 %v1370_v58, %v1370_v58  ;;  %v824_v61 = vadd.f32 %v1370_v58, %v1366_v55 }
 0x169   :  { %v825_v63 = vadd.f32 %v824_v61, %v1368_v57  ;;  %v856_v3 = vadd.f32 %v850_v60, %v849_v59 }
 0x16b   :  { %826 = vadd.xlane.f32.xlu2 %v825_v63  ;;  %v857_v6 = vadd.f32 %v856_v3, %v851_v2 }
 0x16d   :  { %858 = vadd.xlane.f32.xlu0 %v857_v6 }
 0x173   :  { %854 = vadd.xlane.f32.xlu2 %v853_v9 }
 0x1a6   :  { %v813_v10 = vpop.xlane.xlu0 %812 }
 0x1ae   :  { %v817_v11 = vpop.xlane.xlu1 %816  ;;  %v839_v13 = vpop.xlane.xlu0 %838 }
 0x1b6   :  { %v843_v17 = vpop.xlane.xlu1 %842 }
 0x1d6   :  { %v823_v12 = vpop.xlane.xlu2 %822 }
 0x1d7   :  { %v828_v19 = vadd.f32 %v823_v12, %v813_v10 }
 0x1d9   :  { %v862_v24 = vmul.f32 0.0013850415, %v828_v19 }
 0x1db   :  { %v866_v29 = vmul.f32 %v862_v24, %v862_v24 }
 0x1de   :  { %v827_v15 = vpop.xlane.xlu2 %826 }
 0x1df   :  { %v829_v16 = vadd.f32 %v827_v15, %v817_v11 }
 0x1e0   :  { %v859_v18 = vpop.xlane.xlu0 %858 }
 0x1e1   :  { %v863_v20 = vmul.f32 0.0013850415, %v829_v16  ;;  %v861_v21 = vadd.f32 %v859_v18, %v843_v17 }
 0x1e3   :  { %v867_v22 = vmul.f32 %v863_v20, %v863_v20  ;;  %v865_v23 = vmul.f32 0.0013850415, %v861_v21 }
 0x1e5   :  { %v869_v25 = vsub.f32 %v865_v23, %v867_v22 }
 0x1e6   :  { %v855_v26 = vpop.xlane.xlu2 %854 }
 0x1e7   :  { %v871_v27 = vmax.f32 %v869_v25, 0.0  ;;  %v860_v28 = vadd.f32 %v855_v26, %v839_v13 }
 0x1e9   :  { %v875_v30 = vadd.f32 1e-05, %v871_v27  ;;  %v864_v31 = vmul.f32 0.0013850415, %v860_v28 }
 0x1eb   :  { %1070 = vrsqrt.f32 %v875_v30  ;;  %v868_v32 = vsub.f32 %v864_v31, %v866_v29  ;;  %vm892_vm6 = vweird.f32 %v875_v30 }
 0x1ed   :  { %v870_v33 = vmax.f32 %v868_v32, 0.0 }
 0x1ef   :  { %v874_v34 = vadd.f32 1e-05, %v870_v33 }
 0x1f1   :  { %v1071_v35 = vpop.eup %1070  ;;  %1072 = vrsqrt.f32 %v874_v34  ;;  %vm882_vm9 = vweird.f32 %v874_v34 }
 0x1f2   :  { %v887_v36 = vmul.f32 %v1071_v35, %v875_v30  ;;  %vm893_vm5 = vweird.f32 %v1071_v35 }
 0x1f3   :  { %vm894_vm7 = vmor %vm892_vm6, %vm893_vm5 }
 0x1f4   :  { %v888_v37 = vmul.f32 %v1071_v35, %v887_v36 }
 0x1f6   :  { %v889_v40 = vmul.f32 0.5, %v888_v37 }
 0x1f7   :  { %v1073_v41 = vpop.eup %1072 }
 0x1f8   :  { %v877_v42 = vmul.f32 %v1073_v41, %v874_v34  ;;  %v890_v43 = vsub.f32 1.5, %v889_v40  ;;  %vm883_vm8 = vweird.f32 %v1073_v41 }
 0x1f9   :  { %vm884_vm10 = vmor %vm882_vm9, %vm883_vm8 }
 0x1fa   :  { %v878_v45 = vmul.f32 %v1073_v41, %v877_v42  ;;  %v891_v49 = vmul.f32 %v1071_v35, %v890_v43 }
 0x1fc   :  { %v879_v50 = vmul.f32 0.5, %v878_v45  ;;  %v895_v51 = vsel %vm894_vm7, %v1071_v35, %v891_v49 }
 0x1fd   :  { %v897_v53 = vmul.f32 %v895_v51, %v873_v46 }
 0x1fe   :  { %v880_v54 = vsub.f32 1.5, %v879_v50 }
 0x1ff   :  { %911 = vperm.xlu2 %1068, %v897_v53   ;;  %v901_v3 = vmul.f32 %v897_v53, %v863_v20 }
 0x200   :  { %v881_v59 = vmul.f32 %v1073_v41, %v880_v54 }
 0x201   :  { %v903_v6 = vsub.f32 %v899_v4, %v901_v3 }
 0x202   :  { %v885_v60 = vsel %vm884_vm10, %v1073_v41, %v881_v59 }
 0x203   :  { %v896_v61 = vmul.f32 %v885_v60, %v872_v56 }
 0x205   :  { %906 = vperm.xlu1 %1067, %v896_v61   ;;  %v900_v63 = vmul.f32 %v896_v61, %v862_v24 }
 0x207   :  { %v902_v2 = vsub.f32 %v898_v62, %v900_v63 }
 0x209   :  { %922 = vperm.xlu0 %1069, %v902_v2  }
 0x20d   :  { %927 = vperm.xlu1 %1067, %v903_v6  }
 0x259   :  { %v912_v8 = vpop.permute.xlu2 %911 }
 0x25a   :  { %v917_v20 = vmul.f32 %v912_v8, %v1340_v0  ;;  %v918_v21 = vmul.f32 %v912_v8, %v1342_v1  ;;  %v953_v28 = vmul.f32 %v912_v8, %v1368_v57 }
 0x277   :  { %v907_v7 = vpop.permute.xlu1 %906 }
 0x278   :  { %v914_v9 = vmul.f32 %v907_v7, %v1327_v47  ;;  %v915_v10 = vmul.f32 %v907_v7, %v1329_v48  ;;  %v916_v11 = vmul.f32 %v907_v7, %v1331_v52  ;;  %v948_v12 = vmul.f32 %v907_v7, %v1357_v38 }
 0x279   :  { %v949_v13 = vmul.f32 %v907_v7, %v1359_v39  ;;  %v950_v14 = vmul.f32 %v907_v7, %v1361_v44  ;;  %v919_v48 = vmul.f32 %v912_v8, %v1344_v5  ;;  %v951_v39 = vmul.f32 %v912_v8, %v1366_v55 }
 0x27a   :  { %v952_v44 = vmul.f32 %v912_v8, %v1370_v58 }
 0x27b   :  { %v923_v15 = vpop.permute.xlu0 %922 }
 0x27c   :  { %v930_v16 = vadd.f32 %v923_v15, %v914_v9  ;;  %v931_v17 = vadd.f32 %v923_v15, %v915_v10  ;;  %v932_v18 = vadd.f32 %v923_v15, %v916_v11  ;;  %v954_v19 = vadd.f32 %v948_v12, %v923_v15 }
 0x27d   :  { %v955_v47 = vadd.f32 %v949_v13, %v923_v15  ;;  %v956_v22 = vadd.f32 %v950_v14, %v923_v15 }
 0x27e   :  { %v936_v52 = vmax.f32 %v930_v16, 0.0  ;;  %v937_v23 = vmax.f32 %v931_v17, 0.0  ;;  %v938_v38 = vmax.f32 %v932_v18, 0.0  ;;  %v960_v24 = vmax.f32 %v954_v19, 0.0 }
 0x27f   :  { %v928_v25 = vpop.permute.xlu1 %927  ;;  %v961_v0 = vmax.f32 %v955_v47, 0.0  ;;  %v962_v5 = vmax.f32 %v956_v22, 0.0 }
 0x280   :  { %942 = vst [vmem:[%s1451_s4] sm:$0xff] %v936_v52  ;;  %v933_v26 = vadd.f32 %v928_v25, %v917_v20  ;;  %v934_v1 = vadd.f32 %v928_v25, %v918_v21  ;;  %v935_v27 = vadd.f32 %v928_v25, %v919_v48  ;;  %v957_v55 = vadd.f32 %v951_v39, %v928_v25 }
 0x281   :  { %943 = vst [vmem:[%s1451_s4 + $0x8] sm:$0xff] %v937_v23  ;;  %v958_v29 = vadd.f32 %v952_v44, %v928_v25  ;;  %v959_v31 = vadd.f32 %v953_v28, %v928_v25 }
 0x282   :  { %944 = vst [vmem:[%s1451_s4 + $0x10] sm:$0xff] %v938_v38  ;;  %v939_v58 = vmax.f32 %v933_v26, 0.0  ;;  %v940_v30 = vmax.f32 %v934_v1, 0.0  ;;  %v941_v57 = vmax.f32 %v935_v27, 0.0  ;;  %v963_v32 = vmax.f32 %v957_v55, 0.0 }
 0x283   :  { %1057 = vst [vmem:[%s1451_s4 + $0x30] sm:$0xff] %v960_v24  ;;  %v964_v33 = vmax.f32 %v958_v29, 0.0  ;;  %v965_v34 = vmax.f32 %v959_v31, 0.0 }
 0x284   :  { %1058 = vst [vmem:[%s1451_s4 + $0x38] sm:$0xff] %v961_v0 }
 0x285   :  { %1059 = vst [vmem:[%s1451_s4 + $0x40] sm:$0xff] %v962_v5 }
 0x286   :  { %945 = vst [vmem:[%s1451_s4 + $0x18] sm:$0xff] %v939_v58 }
 0x287   :  { %946 = vst [vmem:[%s1451_s4 + $0x20] sm:$0xff] %v940_v30 }
 0x288   :  { %947 = vst [vmem:[%s1451_s4 + $0x28] sm:$0xff] %v941_v57 }
 0x289   :  { %1060 = vst [vmem:[%s1451_s4 + $0x48] sm:$0xff] %v963_v32 }
 0x28a   :  { %1061 = vst [vmem:[%s1451_s4 + $0x50] sm:$0xff] %v964_v33 }
 0x28b   :  { %1062 = vst [vmem:[%s1451_s4 + $0x58] sm:$0xff] %v965_v34 }

</bundles_post_ra>
